<compile_context>
chip_gen: v7x
topology: tpu7x:2x2x1
jax: 0.10.0
libtpu: 0.0.40
codegen_flags: <defaults>
</compile_context>

<pallas_src>
import math

import jax
import jax.numpy as jnp
from jax.experimental import pallas as pl
from jax.experimental.pallas import tpu as pltpu


def _round_up(x, m):
    return (x + m - 1) // m * m


def _encode_kernel(x_ref, wg_ref, bg_ref, o_ref):
    # x_ref : (TM, 2g)   g points per row == row-major view of the (..., 2) input
    # wg_ref: (2g, gC)   block-diagonal weight, Wg[2j+k, C*j+c] = W[c, k]
    # bg_ref: (1,  gC)   bias tiled g times (f32)
    # o_ref : (TM, gC)   row-major view of the (..., C) output (128-lane dense)
    acc = jnp.dot(
        x_ref[...],
        wg_ref[...],
        preferred_element_type=jnp.float32,
        precision=jax.lax.Precision.HIGHEST,
    )
    o_ref[...] = (acc + bg_ref[...]).astype(o_ref.dtype)


def _choose_tiling(mg, g, C, itemsize, row_cap=32768, vmem_budget=16 << 20):
    """Pick (tile rows, n_tiles, padded grouped rows) for grid=(n_tiles,)."""
    gC = g * C
    # Double-buffered input + output tile bytes per grouped row.
    per_row = 2 * itemsize * (gC + max(2 * g, 8))
    cap = max(8, min(row_cap // max(g, 1), vmem_budget // per_row))
    cap = max(8, (cap // 8) * 8)
    n_tiles = pl.cdiv(mg, cap)
    # Keep >=4 grid steps when there is enough data: lets v7x's two TCs split
    # the "parallel" axis while each still double-buffers its DMAs.
    n_tiles = max(n_tiles, min(4, pl.cdiv(mg, 8)))
    tm = _round_up(pl.cdiv(mg, n_tiles), 8)
    return tm, n_tiles, tm * n_tiles


def encode_locations(batch_locations, weight, bias, *, out_dtype=None):
    """Pallas equivalent of nn.Linear(2, C)(batch_locations).

    batch_locations: (..., 2)
    weight:          (C, 2)   -- PyTorch nn.Linear convention
    bias:            (C,)
    returns:         (..., C) in `out_dtype` (defaults to the input dtype)
    """
    lead_shape = batch_locations.shape[:-1]
    in_dim = batch_locations.shape[-1]
    assert in_dim == 2, "EncodeLocations expects (..., 2) inputs"
    C = weight.shape[0]
    dtype = batch_locations.dtype
    out_dtype = dtype if out_dtype is None else out_dtype
    itemsize = max(jnp.dtype(dtype).itemsize, jnp.dtype(out_dtype).itemsize)

    # Group g points per kernel row so the output's last dim g*C is a multiple
    # of 128 lanes; kernel tiles are then bitwise row-major views of both the
    # input and the output -> zero wrapper transposes / extra HBM passes.
    g = 128 // math.gcd(C, 128)
    gC = g * C

    x2d = batch_locations.reshape(-1, in_dim)          # (M, 2), row-major
    M = x2d.shape[0]
    mg = pl.cdiv(max(M, 1), g)                         # grouped rows needed
    TM, n_tiles, mg_pad = _choose_tiling(mg, g, C, itemsize)
    m_pad = mg_pad * g

    if m_pad != M:
        x2d = jnp.pad(x2d, ((0, m_pad - M), (0, 0)))
    xg = x2d.reshape(mg_pad, 2 * g)                    # free reshape (row-major)

    # Block-diagonal weight: Wg[2j+k, C*j+c] = W[c, k]; g-tiled bias kept in f32.
    w_t = weight.astype(dtype).T                       # (2, C)
    wg = jax.scipy.linalg.block_diag(*([w_t] * g))     # (2g, gC)
    bg = jnp.tile(bias.astype(jnp.float32), g).reshape(1, gC)

    cost = pl.CostEstimate(
        flops=2 * m_pad * in_dim * C + m_pad * C,
        transcendentals=0,
        bytes_accessed=itemsize * (m_pad * in_dim + m_pad * C)
        + 4 * (2 * g * gC + gC),
    )

    out_g = pl.pallas_call(
        _encode_kernel,
        out_shape=jax.ShapeDtypeStruct((mg_pad, gC), out_dtype),
        grid=(n_tiles,),
        in_specs=[
            pl.BlockSpec((TM, 2 * g), lambda i: (i, 0)),   # streamed points
            pl.BlockSpec((2 * g, gC), lambda i: (0, 0)),   # resident weight
            pl.BlockSpec((1, gC), lambda i: (0, 0)),       # resident bias
        ],
        out_specs=pl.BlockSpec((TM, gC), lambda i: (i, 0)),
        compiler_params=pltpu.CompilerParams(
            dimension_semantics=("parallel",),             # shard M across TCs
        ),
        cost_estimate=cost,
    )(xg, wg, bg)

    out = out_g.reshape(m_pad, C)                      # free reshape (row-major)
    if m_pad != M:
        out = out[:M]
    return out.reshape(*lead_shape, C)


if __name__ == "__main__":
    num_channels = 32
    B, N = 2, 8

    key = jax.random.PRNGKey(0)
    k_x, k_w, k_b = jax.random.split(key, 3)

    # Deterministic "PyTorch-style" Linear init: U(-1/sqrt(fan_in), 1/sqrt(fan_in))
    bound = 1.0 / jnp.sqrt(2.0)
    weight = jax.random.uniform(k_w, (num_channels, 2), jnp.float32, -bound, bound)
    bias = jax.random.uniform(k_b, (num_channels,), jnp.float32, -bound, bound)

    batch_locations = jax.random.normal(k_x, (B, N, 2), jnp.float32)

    out = jax.block_until_ready(encode_locations(batch_locations, weight, bias))

    # Reference check in plain JAX (f32-accurate matmul to match the kernel).
    ref = (
        jnp.einsum(
            "...k,ck->...c",
            batch_locations,
            weight,
            precision=jax.lax.Precision.HIGHEST,
        )
        + bias
    )
    assert out.shape == (B, N, num_channels)
    assert jnp.allclose(out, ref, atol=1e-5, rtol=1e-5)

    print("KERNEL_OK")
</pallas_src>

<mosaic_0001>
module attributes {stable_mosaic.version = 11 : i64} {
  func.func @_encode_kernel(%arg0: i32, %arg1: memref<8x8xf32, #tpu.memory_space<vmem>>, %arg2: memref<8x128xf32, #tpu.memory_space<vmem>>, %arg3: memref<1x128xf32, #tpu.memory_space<vmem>>, %arg4: memref<8x128xf32, #tpu.memory_space<vmem>>) attributes {dimension_semantics = [#tpu.dimension_semantics<parallel>], iteration_bounds = array<i64: 1>, scalar_prefetch = 0 : i64, scratch_operands = 0 : i64, tpu.core_type = #tpu.core_type<tc>, window_params = [{transform_indices = @transform_0, window_bounds = array<i64: 8, 8>}, {pipeline_mode = #tpu.pipeline_mode<synchronous>, transform_indices = @transform_1, window_bounds = array<i64: 8, 128>}, {pipeline_mode = #tpu.pipeline_mode<synchronous>, transform_indices = @transform_2, window_bounds = array<i64: 1, 128>}, {transform_indices = @transform_3, window_bounds = array<i64: 8, 128>}]} {
    %c0 = arith.constant 0 : index
    %c0_0 = arith.constant 0 : index
    %0 = vector.load %arg1[%c0, %c0_0] : memref<8x8xf32, #tpu.memory_space<vmem>>, vector<8x8xf32>
    %c0_1 = arith.constant 0 : index
    %c0_2 = arith.constant 0 : index
    %1 = vector.load %arg2[%c0_1, %c0_2] : memref<8x128xf32, #tpu.memory_space<vmem>>, vector<8x128xf32>
    %cst = arith.constant dense<0.000000e+00> : vector<8x128xf32>
    %2 = tpu.matmul %0, %1, %cst {dimension_numbers = #tpu.dot_dimension_numbers<[1], [0], [0], [1], [0, 0, 1, 1], [], []>, precision = #tpu.contract_precision<fp32>} : vector<8x8xf32>, vector<8x128xf32>, vector<8x128xf32> -> vector<8x128xf32>
    %c0_3 = arith.constant 0 : index
    %c0_4 = arith.constant 0 : index
    %3 = vector.load %arg3[%c0_3, %c0_4] : memref<1x128xf32, #tpu.memory_space<vmem>>, vector<1x128xf32>
    %4 = vector.broadcast %3 : vector<1x128xf32> to vector<8x128xf32>
    %5 = arith.addf %2, %4 : vector<8x128xf32>
    %c0_5 = arith.constant 0 : index
    %c0_6 = arith.constant 0 : index
    %6 = vector.load %arg4[%c0_5, %c0_6] : memref<8x128xf32, #tpu.memory_space<vmem>>, vector<8x128xf32>
    tpu.vector_store %arg4[%c0_5, %c0_6], %5 {strides = array<i32>} : memref<8x128xf32, #tpu.memory_space<vmem>>, vector<8x128xf32>,
    return
  }
  func.func @transform_0(%arg0: i32) -> (i32, i32) {
    %c0_i32 = arith.constant 0 : i32
    %c0_i32_0 = arith.constant 0 : i32
    return %arg0, %c0_i32 : i32, i32
  }
  func.func @transform_1(%arg0: i32) -> (i32, i32) {
    %c0_i32 = arith.constant 0 : i32
    %c0_i32_0 = arith.constant 0 : i32
    %c0_i32_1 = arith.constant 0 : i32
    return %c0_i32, %c0_i32_0 : i32, i32
  }
  func.func @transform_2(%arg0: i32) -> (i32, i32) {
    %c0_i32 = arith.constant 0 : i32
    %c0_i32_0 = arith.constant 0 : i32
    %c0_i32_1 = arith.constant 0 : i32
    return %c0_i32, %c0_i32_0 : i32, i32
  }
  func.func @transform_3(%arg0: i32) -> (i32, i32) {
    %c0_i32 = arith.constant 0 : i32
    %c0_i32_0 = arith.constant 0 : i32
    return %arg0, %c0_i32 : i32, i32
  }
}

</mosaic_0001>

<bundles_post_ra>
// kernel: tpu_custom_call.1
= control target key start
LH: loop header
LB: loop body
LE: loop exit
PB: predicated region body
PF: predicated region fallthrough
CT: control target
= control target key end

     0   :  { %8 = vsyncpa [#allocation3], 0  ;;  %s715_s0 = inlined_call_operand.hbm [shape: f32[8,8], index: 0, kind: input, shape index: {}]   ;;  %s716_s1 = inlined_call_operand.hbm [shape: f32[8,128], index: 1, kind: input, shape index: {}]   ;;  %s717_s2 = inlined_call_operand.vmem [shape: f32[1,128], index: 2, kind: input, shape index: {}]   ;;  %s718_s3 = inlined_call_operand.hbm [shape: f32[8,128], index: 3, kind: output, shape index: {}]  }
   0x1   :  { %9 = vsyncpa [#allocation6], 0 }
   0x2   :  { %10 = vsyncpa [#allocation4], 0  ;;  %s645_s12 = smov [#allocation2]   ;;  %s646_s14 = smov [#allocation5]  }
   0x3   :  { %s17_s13 = sshll.u32 %s645_s12, 4  ;;  %s27_s15 = sshll.u32 %s646_s14, 4  ;;  %s18_s13 = int_to_ptr.vmem [resolvable:$true] %s17_s13  ;;  %s28_s15 = int_to_ptr.vmem [resolvable:$true] %s27_s15 }
   0x4   :  { %s573_s18 = scalar_lea.hbm %s715_s0, 128 }
   0x5   :  { %p574_p0 = scmp.ne.s32.totalorder %s715_s0, %s573_s18  ;;  %p577_p1 = scmp.lt.u32.totalorder %s573_s18, %s715_s0 }
   0x7   :  { %p579_p2 = pnand %p577_p1, %p574_p0 }
   0x9   :  { %582 = shalt.err (!%p579_p2)
}
   0xa   :  { %s583_s23 = scalar_lea.vmem %s18_s13, 128  ;;  %p588_p4 = scmp.lt.s32.totalorder %s18_s13, %s18_s13 }
   0xb   :  { %p584_p3 = scmp.ne.s32.totalorder %s18_s13, %s583_s23  ;;  %p589_p5 = scmp.lt.s32.totalorder %s583_s23, %s583_s23 }
   0xd   :  { %p590_p6 = por %p589_p5, %p588_p4 }
   0xf   :  { %p591_p7 = pnand %p590_p6, %p584_p3 }
  0x11   :  { %594 = shalt.err (!%p591_p7)
}
  0x12   :  { %20 = dma.hbm_to_vmem [thread:$0]  %s715_s0, 128, %s18_s13, [#allocation3]  }
  0x13   :  { %s595_s28 = scalar_lea.hbm %s716_s1, 128 }
  0x14   :  { %p596_p8 = scmp.ne.s32.totalorder %s716_s1, %s595_s28  ;;  %p599_p9 = scmp.lt.u32.totalorder %s595_s28, %s716_s1 }
  0x16   :  { %p601_p10 = pnand %p599_p9, %p596_p8 }
  0x18   :  { %604 = shalt.err (!%p601_p10)
}
  0x19   :  { %s605_s6 = scalar_lea.vmem %s28_s15, 128  ;;  %p610_p12 = scmp.lt.s32.totalorder %s28_s15, %s28_s15 }
  0x1a   :  { %p606_p11 = scmp.ne.s32.totalorder %s28_s15, %s605_s6  ;;  %p611_p13 = scmp.lt.s32.totalorder %s605_s6, %s605_s6 }
  0x1c   :  { %p612_p0 = por %p611_p13, %p610_p12 }
  0x1e   :  { %p613_p1 = pnand %p612_p0, %p606_p11 }
  0x20   :  { %616 = shalt.err (!%p613_p1)
}
  0x21   :  { %30 = dma.hbm_to_vmem [thread:$0]  %s716_s1, 128, %s28_s15, [#allocation6]  }
  0x22   :  { %639 = dma.done.wait [#allocation3], 128  }
  0x23   :  { %640 = vsyncadd [#allocation3], 4294967168 }
  0x24   :  { %641 = dma.done.wait [#allocation6], 128  }
  0x25   :  { %642 = vsyncadd [#allocation6], 4294967168  ;;  %v647_v0 = vmov 0.0   ;;  %vm648_vm0 = vmmov 0   ;;  %vm48_vm1 = vcmask 64512   ;;  %v40_v1 = vld [vmem:[#allocation5] sm:$0xff] }
  0x26   :  { %543 = vmatprep.subr.mxu0 %v647_v0  ;;  %545 = vmatprep.mubr.msk.f32.mxu0 %vm648_vm0, %v647_v0  ;;  %v39_v2 = vld [vmem:[#allocation2] sm:$0xff]  ;;  %v53_v3 = vand.u32 4294901760, %v40_v1  ;;  %s649_s9 = smov [#allocation7]  }
  0x27   :  { %528 = vmatprep.subr.mxu1 %v647_v0  ;;  %530 = vmatprep.mubr.msk.f32.mxu1 %vm648_vm0, %v647_v0  ;;  %v50_v4 = vsel %vm48_vm1, %v39_v2, 0  ;;  %v515_v16 = vld [vmem:[%s717_s2] ss:$0 sm:$0xff]  ;;  %s505_s10 = sshll.u32 %s649_s9, 4  ;;  %s506_s10 = int_to_ptr.vmem [resolvable:$true] %s505_s10 }
  0x28   :  { %v118_v5 = vand.u32 4294901760, %v50_v4  ;;  %v130_v6 = vsub.f32 %v40_v1, %v53_v3  ;;  %544 = vmatpush3.msra.mxu0 %v53_v3  ;;  %529 = vmatpush3.msra.mxu1 %v53_v3  ;;  %s617_s11 = scalar_lea.vmem %s506_s10, 128  ;;  %p622_p3 = scmp.lt.s32.totalorder %s506_s10, %s506_s10 }
  0x29   :  { %533 = vmatprep.subr.mxu1 %v647_v0  ;;  %548 = vmatprep.subr.mxu0 %v647_v0  ;;  %p618_p2 = scmp.ne.s32.totalorder %s506_s10, %s617_s11  ;;  %p623_p4 = scmp.lt.s32.totalorder %s617_s11, %s617_s11 }
  0x2a   :  { %v119_v7 = vsub.f32 %v50_v4, %v118_v5  ;;  %v131_v8 = vand.u32 4294901760, %v130_v6 }
  0x2b   :  { %p624_p5 = por %p623_p4, %p622_p3 }
  0x2c   :  { %v120_v9 = vand.u32 4294901760, %v119_v7  ;;  %v132_v10 = vsub.f32 %v130_v6, %v131_v8 }
  0x2d   :  { %p625_p6 = pnand %p624_p5, %p618_p2 }
  0x2e   :  { %546 = vmatmul.mubr.f32.vlgmr.msra.gmra.mrb[0].mxu0 %v120_v9  ;;  %v121_v11 = vsub.f32 %v119_v7, %v120_v9  ;;  %v133_v12 = vand.u32 4294901760, %v132_v10 }
  0x2f   :  { %549 = vmatpush3.msra.mxu0 %v131_v8  ;;  %550 = vmatprep.mubr.msk.f32.mxu0 %vm648_vm0, %v647_v0 }
  0x30   :  { %v122_v13 = vand.u32 4294901760, %v121_v11  ;;  %553 = vmatprep.subr.mxu0 %v647_v0 }
  0x32   :  { %531 = vmatmul.mubr.f32.vlgmr.msra.gmra.mrb[0].mxu1 %v122_v13 }
  0x33   :  { %534 = vmatpush3.msra.mxu1 %v133_v12  ;;  %535 = vmatprep.mubr.msk.f32.mxu1 %vm648_vm0, %v647_v0 }
  0x34   :  { %538 = vmatprep.subr.mxu1 %v647_v0 }
  0x36   :  { %551 = vmatmul.mubr.f32.vlgmr.msra.gmra.mrb[0].mxu0 %v118_v5 }
  0x37   :  { %554 = vmatpush3.msra.mxu0 %v53_v3  ;;  %555 = vmatprep.mubr.msk.f32.mxu0 %vm648_vm0, %v647_v0 }
  0x3a   :  { %536 = vmatmul.mubr.f32.vlgmr.msra.gmra.mrb[0].mxu1 %v118_v5 }
  0x3b   :  { %539 = vmatpush3.msra.mxu1 %v130_v6  ;;  %540 = vmatprep.mubr.msk.f32.mxu1 %vm648_vm0, %v647_v0 }
  0x3e   :  { %556 = vmatmul.mubr.f32.vlgmr.msra.gmra.mrb[0].mxu0 %v118_v5 }
  0x42   :  { %541 = vmatmul.mubr.f32.vlgmr.msra.gmra.mrb[0].mxu1 %v119_v7 }
 0x111   :  { %v494_v14 = vpop.f32.mrb[0].mxu0 }
 0x112   :  { %v557_v15 = vpop.f32.mrb[1].mxu0 }
 0x115   :  { %v274_v17 = vpop.f32.mrb[0].mxu1 }
 0x116   :  { %v558_v18 = vadd.f32 %v515_v16, %v274_v17  ;;  %v542_v19 = vpop.f32.mrb[1].mxu1 }
 0x118   :  { %v559_v20 = vadd.f32 %v558_v18, %v494_v14 }
 0x11a   :  { %498 = vst [vmem:[#allocation7] sm:$0xff] %v559_v20 }
 0x11b   :  { %628 = shalt.err (!%p625_p6)
}
 0x11c   :  { %s629_s14 = scalar_lea.hbm %s718_s3, 128 }
 0x11d   :  { %p630_p7 = scmp.ne.s32.totalorder %s718_s3, %s629_s14  ;;  %p633_p8 = scmp.lt.u32.totalorder %s629_s14, %s718_s3 }
 0x11f   :  { %p635_p9 = pnand %p633_p8, %p630_p7 }
 0x121   :  { %638 = shalt.err (!%p635_p9)
}
 0x122   :  { %508 = dma.vmem_to_hbm [thread:$0]  %s506_s10, 128, %s718_s3, [#allocation4]  }
 0x123   :  { %643 = dma.done.wait [#allocation4], 128  }
 0x124   :  { %644 = vsyncadd [#allocation4], 4294967168 }
 0x125   :  { %512 = vsyncpa [#allocation3], 1 }
 0x126   :  { %513 = vsyncpa [#allocation6], 1 }
 0x127   :  { %514 = vsyncpa [#allocation4], 1 }

</bundles_post_ra>
